<compile_context>
chip_gen: v6e
topology: v6e:2x2x1
jax: 0.10.0
libtpu: 0.0.40
codegen_flags: <defaults>
</compile_context>

<pallas_src>
import jax
import jax.numpy as jnp
from jax.experimental import pallas as pl
from jax.experimental.pallas import tpu as pltpu

EPS = 1e-5
LANES = 128
SUBLANES = 8


def _sigmoid(z):
    # one EUP op instead of exp + divide
    return 0.5 * jnp.tanh(0.5 * z) + 0.5


def _bn_mlp_kernel(p_ref, x_ref, o_ref):
    """Fused BN(apply) -> Linear(2,3) -> Sigmoid -> Linear(3,1) -> Sigmoid.

    p_ref: SMEM f32[17] packed params:
        [0:2]   scale  = gamma * rsqrt(var + eps)
        [2:4]   shift  = beta - mean * scale
        [4:10]  W1 (2,3) row-major
        [10:13] b1
        [13:16] W2 (3,)
        [16]    b2
    x_ref: VMEM f32[2, TILE_R, 128]   (features, batch-sublane, batch-lane)
    o_ref: VMEM f32[TILE_R, 128]
    """
    x0 = x_ref[0]                               # (TILE_R, 128)
    x1 = x_ref[1]

    # ---- BatchNorm1d apply (stats precomputed over the full batch) ----
    z0 = x0 * p_ref[0] + p_ref[2]
    z1 = x1 * p_ref[1] + p_ref[3]

    # ---- Linear(2, 3) + Sigmoid : unrolled VPU FMAs over SMEM scalars ----
    h0 = _sigmoid(z0 * p_ref[4] + z1 * p_ref[7] + p_ref[10])
    h1 = _sigmoid(z0 * p_ref[5] + z1 * p_ref[8] + p_ref[11])
    h2 = _sigmoid(z0 * p_ref[6] + z1 * p_ref[9] + p_ref[12])

    # ---- Linear(3, 1) + Sigmoid ----
    y = h0 * p_ref[13] + h1 * p_ref[14] + h2 * p_ref[15] + p_ref[16]
    o_ref[...] = _sigmoid(y)


def neural_network_forward(x, params, *, tile_rows=512):
    """x: (N, 2) float32.  params: gamma(2,), beta(2,), w1(2,3), b1(3,), w2(3,1), b2(1,)."""
    n = x.shape[0]
    x = x.astype(jnp.float32)

    # ---- full-batch BN statistics (training mode, biased variance), hoisted
    #      out of the streaming kernel so tiling over N keeps exact numerics.
    mean = jnp.mean(x, axis=0)                                   # (2,)
    var = jnp.mean(jnp.square(x - mean), axis=0)                 # (2,)
    scale = params["gamma"].reshape(-1) * jax.lax.rsqrt(var + EPS)
    shift = params["beta"].reshape(-1) - mean * scale

    pvec = jnp.concatenate([
        scale, shift,
        params["w1"].reshape(-1),          # (6,)  row-major (in=2, out=3)
        params["b1"].reshape(-1),          # (3,)
        params["w2"].reshape(-1),          # (3,)
        params["b2"].reshape(-1),          # (1,)
    ]).astype(jnp.float32)                 # (17,)

    # ---- lane-dense layout: batch -> (rows, 128), features lead ----
    rows = pl.cdiv(n, LANES)
    rows_rounded = ((rows + SUBLANES - 1) // SUBLANES) * SUBLANES
    tile_rows = max(SUBLANES, min(tile_rows, rows_rounded))
    rows_pad = ((rows + tile_rows - 1) // tile_rows) * tile_rows
    n_pad = rows_pad * LANES

    xt = jnp.zeros((2, n_pad), jnp.float32).at[:, :n].set(x.T)
    xt = xt.reshape(2, rows_pad, LANES)

    yt = pl.pallas_call(
        _bn_mlp_kernel,
        out_shape=jax.ShapeDtypeStruct((rows_pad, LANES), jnp.float32),
        grid=(rows_pad // tile_rows,),
        in_specs=[
            pl.BlockSpec(memory_space=pltpu.MemorySpace.SMEM),          # packed params
            pl.BlockSpec((2, tile_rows, LANES), lambda i: (0, i, 0)),   # x tiles
        ],
        out_specs=pl.BlockSpec((tile_rows, LANES), lambda i: (i, 0)),
        compiler_params=pltpu.CompilerParams(
            dimension_semantics=("parallel",)),
    )(pvec, xt)

    return yt.reshape(n_pad)[:n].reshape(n, 1)


def init_params(key):
    """Deterministic init mimicking PyTorch defaults (uniform +-1/sqrt(fan_in))."""
    k1, k2, k3, k4 = jax.random.split(key, 4)
    bound1 = 1.0 / jnp.sqrt(2.0)
    bound2 = 1.0 / jnp.sqrt(3.0)
    return {
        "gamma": jnp.ones((2,), jnp.float32),
        "beta": jnp.zeros((2,), jnp.float32),
        "w1": jax.random.uniform(k1, (2, 3), jnp.float32, -bound1, bound1),
        "b1": jax.random.uniform(k2, (3,), jnp.float32, -bound1, bound1),
        "w2": jax.random.uniform(k3, (3, 1), jnp.float32, -bound2, bound2),
        "b2": jax.random.uniform(k4, (1,), jnp.float32, -bound2, bound2),
    }


def _reference(x, p):
    mean = jnp.mean(x, axis=0, keepdims=True)
    var = jnp.mean((x - mean) ** 2, axis=0, keepdims=True)
    xb = (x - mean) / jnp.sqrt(var + EPS) * p["gamma"] + p["beta"]
    h = jax.nn.sigmoid(xb @ p["w1"] + p["b1"])
    return jax.nn.sigmoid(h @ p["w2"] + p["b2"])


if __name__ == "__main__":
    key = jax.random.PRNGKey(0)
    kx, kp = jax.random.split(key)
    N = 8
    x = jax.random.normal(kx, (N, 2), jnp.float32)
    params = init_params(kp)

    out = jax.block_until_ready(neural_network_forward(x, params))
    ref = _reference(x, params)

    assert out.shape == (N, 1)
    assert jnp.allclose(out, ref, atol=1e-5, rtol=1e-5), (out, ref)
    print("KERNEL_OK")
</pallas_src>

<mosaic_0001>
module attributes {stable_mosaic.version = 11 : i64} {
  func.func @_bn_mlp_kernel(%arg0: i32, %arg1: memref<17xf32, #tpu.memory_space<smem>>, %arg2: memref<2x8x128xf32, #tpu.memory_space<vmem>>, %arg3: memref<8x128xf32, #tpu.memory_space<vmem>>) attributes {dimension_semantics = [#tpu.dimension_semantics<parallel>], iteration_bounds = array<i64: 1>, scalar_prefetch = 0 : i64, scratch_operands = 0 : i64, tpu.core_type = #tpu.core_type<tc>, window_params = [{transform_indices = @transform_0, window_bounds = array<i64: 17>}, {transform_indices = @transform_1, window_bounds = array<i64: 2, 8, 128>}, {transform_indices = @transform_2, window_bounds = array<i64: 8, 128>}]} {
    %c0 = arith.constant 0 : index
    %c0_0 = arith.constant 0 : index
    %c0_1 = arith.constant 0 : index
    %0 = vector.load %arg2[%c0, %c0_0, %c0_1] : memref<2x8x128xf32, #tpu.memory_space<vmem>>, vector<1x8x128xf32>
    %1 = vector.shape_cast %0 : vector<1x8x128xf32> to vector<8x128xf32>
    %c1 = arith.constant 1 : index
    %c0_2 = arith.constant 0 : index
    %c0_3 = arith.constant 0 : index
    %2 = vector.load %arg2[%c1, %c0_2, %c0_3] : memref<2x8x128xf32, #tpu.memory_space<vmem>>, vector<1x8x128xf32>
    %3 = vector.shape_cast %2 : vector<1x8x128xf32> to vector<8x128xf32>
    %c0_4 = arith.constant 0 : index
    %4 = memref.load %arg1[%c0_4] : memref<17xf32, #tpu.memory_space<smem>>
    %5 = vector.broadcast %4 : f32 to vector<8x128xf32>
    %6 = arith.mulf %1, %5 : vector<8x128xf32>
    %c2 = arith.constant 2 : index
    %7 = memref.load %arg1[%c2] : memref<17xf32, #tpu.memory_space<smem>>
    %8 = vector.broadcast %7 : f32 to vector<8x128xf32>
    %9 = arith.addf %6, %8 : vector<8x128xf32>
    %c1_5 = arith.constant 1 : index
    %10 = memref.load %arg1[%c1_5] : memref<17xf32, #tpu.memory_space<smem>>
    %11 = vector.broadcast %10 : f32 to vector<8x128xf32>
    %12 = arith.mulf %3, %11 : vector<8x128xf32>
    %c3 = arith.constant 3 : index
    %13 = memref.load %arg1[%c3] : memref<17xf32, #tpu.memory_space<smem>>
    %14 = vector.broadcast %13 : f32 to vector<8x128xf32>
    %15 = arith.addf %12, %14 : vector<8x128xf32>
    %c4 = arith.constant 4 : index
    %16 = memref.load %arg1[%c4] : memref<17xf32, #tpu.memory_space<smem>>
    %17 = vector.broadcast %16 : f32 to vector<8x128xf32>
    %18 = arith.mulf %9, %17 : vector<8x128xf32>
    %c7 = arith.constant 7 : index
    %19 = memref.load %arg1[%c7] : memref<17xf32, #tpu.memory_space<smem>>
    %20 = vector.broadcast %19 : f32 to vector<8x128xf32>
    %21 = arith.mulf %15, %20 : vector<8x128xf32>
    %22 = arith.addf %18, %21 : vector<8x128xf32>
    %c10 = arith.constant 10 : index
    %23 = memref.load %arg1[%c10] : memref<17xf32, #tpu.memory_space<smem>>
    %24 = vector.broadcast %23 : f32 to vector<8x128xf32>
    %25 = arith.addf %22, %24 : vector<8x128xf32>
    %cst = arith.constant 5.000000e-01 : f32
    %26 = vector.broadcast %cst : f32 to vector<8x128xf32>
    %27 = arith.mulf %26, %25 : vector<8x128xf32>
    %28 = math.tanh %27 : vector<8x128xf32>
    %cst_6 = arith.constant 5.000000e-01 : f32
    %29 = vector.broadcast %cst_6 : f32 to vector<8x128xf32>
    %30 = arith.mulf %29, %28 : vector<8x128xf32>
    %cst_7 = arith.constant 5.000000e-01 : f32
    %31 = vector.broadcast %cst_7 : f32 to vector<8x128xf32>
    %32 = arith.addf %30, %31 : vector<8x128xf32>
    %c5 = arith.constant 5 : index
    %33 = memref.load %arg1[%c5] : memref<17xf32, #tpu.memory_space<smem>>
    %34 = vector.broadcast %33 : f32 to vector<8x128xf32>
    %35 = arith.mulf %9, %34 : vector<8x128xf32>
    %c8 = arith.constant 8 : index
    %36 = memref.load %arg1[%c8] : memref<17xf32, #tpu.memory_space<smem>>
    %37 = vector.broadcast %36 : f32 to vector<8x128xf32>
    %38 = arith.mulf %15, %37 : vector<8x128xf32>
    %39 = arith.addf %35, %38 : vector<8x128xf32>
    %c11 = arith.constant 11 : index
    %40 = memref.load %arg1[%c11] : memref<17xf32, #tpu.memory_space<smem>>
    %41 = vector.broadcast %40 : f32 to vector<8x128xf32>
    %42 = arith.addf %39, %41 : vector<8x128xf32>
    %cst_8 = arith.constant 5.000000e-01 : f32
    %43 = vector.broadcast %cst_8 : f32 to vector<8x128xf32>
    %44 = arith.mulf %43, %42 : vector<8x128xf32>
    %45 = math.tanh %44 : vector<8x128xf32>
    %cst_9 = arith.constant 5.000000e-01 : f32
    %46 = vector.broadcast %cst_9 : f32 to vector<8x128xf32>
    %47 = arith.mulf %46, %45 : vector<8x128xf32>
    %cst_10 = arith.constant 5.000000e-01 : f32
    %48 = vector.broadcast %cst_10 : f32 to vector<8x128xf32>
    %49 = arith.addf %47, %48 : vector<8x128xf32>
    %c6 = arith.constant 6 : index
    %50 = memref.load %arg1[%c6] : memref<17xf32, #tpu.memory_space<smem>>
    %51 = vector.broadcast %50 : f32 to vector<8x128xf32>
    %52 = arith.mulf %9, %51 : vector<8x128xf32>
    %c9 = arith.constant 9 : index
    %53 = memref.load %arg1[%c9] : memref<17xf32, #tpu.memory_space<smem>>
    %54 = vector.broadcast %53 : f32 to vector<8x128xf32>
    %55 = arith.mulf %15, %54 : vector<8x128xf32>
    %56 = arith.addf %52, %55 : vector<8x128xf32>
    %c12 = arith.constant 12 : index
    %57 = memref.load %arg1[%c12] : memref<17xf32, #tpu.memory_space<smem>>
    %58 = vector.broadcast %57 : f32 to vector<8x128xf32>
    %59 = arith.addf %56, %58 : vector<8x128xf32>
    %cst_11 = arith.constant 5.000000e-01 : f32
    %60 = vector.broadcast %cst_11 : f32 to vector<8x128xf32>
    %61 = arith.mulf %60, %59 : vector<8x128xf32>
    %62 = math.tanh %61 : vector<8x128xf32>
    %cst_12 = arith.constant 5.000000e-01 : f32
    %63 = vector.broadcast %cst_12 : f32 to vector<8x128xf32>
    %64 = arith.mulf %63, %62 : vector<8x128xf32>
    %cst_13 = arith.constant 5.000000e-01 : f32
    %65 = vector.broadcast %cst_13 : f32 to vector<8x128xf32>
    %66 = arith.addf %64, %65 : vector<8x128xf32>
    %c13 = arith.constant 13 : index
    %67 = memref.load %arg1[%c13] : memref<17xf32, #tpu.memory_space<smem>>
    %68 = vector.broadcast %67 : f32 to vector<8x128xf32>
    %69 = arith.mulf %32, %68 : vector<8x128xf32>
    %c14 = arith.constant 14 : index
    %70 = memref.load %arg1[%c14] : memref<17xf32, #tpu.memory_space<smem>>
    %71 = vector.broadcast %70 : f32 to vector<8x128xf32>
    %72 = arith.mulf %49, %71 : vector<8x128xf32>
    %73 = arith.addf %69, %72 : vector<8x128xf32>
    %c15 = arith.constant 15 : index
    %74 = memref.load %arg1[%c15] : memref<17xf32, #tpu.memory_space<smem>>
    %75 = vector.broadcast %74 : f32 to vector<8x128xf32>
    %76 = arith.mulf %66, %75 : vector<8x128xf32>
    %77 = arith.addf %73, %76 : vector<8x128xf32>
    %c16 = arith.constant 16 : index
    %78 = memref.load %arg1[%c16] : memref<17xf32, #tpu.memory_space<smem>>
    %79 = vector.broadcast %78 : f32 to vector<8x128xf32>
    %80 = arith.addf %77, %79 : vector<8x128xf32>
    %cst_14 = arith.constant 5.000000e-01 : f32
    %81 = vector.broadcast %cst_14 : f32 to vector<8x128xf32>
    %82 = arith.mulf %81, %80 : vector<8x128xf32>
    %83 = math.tanh %82 : vector<8x128xf32>
    %cst_15 = arith.constant 5.000000e-01 : f32
    %84 = vector.broadcast %cst_15 : f32 to vector<8x128xf32>
    %85 = arith.mulf %84, %83 : vector<8x128xf32>
    %cst_16 = arith.constant 5.000000e-01 : f32
    %86 = vector.broadcast %cst_16 : f32 to vector<8x128xf32>
    %87 = arith.addf %85, %86 : vector<8x128xf32>
    %c0_17 = arith.constant 0 : index
    %c0_18 = arith.constant 0 : index
    %88 = vector.load %arg3[%c0_17, %c0_18] : memref<8x128xf32, #tpu.memory_space<vmem>>, vector<8x128xf32>
    tpu.vector_store %arg3[%c0_17, %c0_18], %87 {strides = array<i32>} : memref<8x128xf32, #tpu.memory_space<vmem>>, vector<8x128xf32>,
    return
  }
  func.func @transform_0(%arg0: i32) -> i32 {
    %c0_i32 = arith.constant 0 : i32
    %c0_i32_0 = arith.constant 0 : i32
    return %c0_i32 : i32
  }
  func.func @transform_1(%arg0: i32) -> (i32, i32, i32) {
    %c0_i32 = arith.constant 0 : i32
    %c0_i32_0 = arith.constant 0 : i32
    %c0_i32_1 = arith.constant 0 : i32
    return %c0_i32, %arg0, %c0_i32_0 : i32, i32, i32
  }
  func.func @transform_2(%arg0: i32) -> (i32, i32) {
    %c0_i32 = arith.constant 0 : i32
    %c0_i32_0 = arith.constant 0 : i32
    return %arg0, %c0_i32 : i32, i32
  }
}

</mosaic_0001>

<bundles_post_ra>
// kernel: tpu_custom_call.1
= control target key start
LH: loop header
LB: loop body
LE: loop exit
PB: predicated region body
PF: predicated region fallthrough
CT: control target
= control target key end

     0   :  { %7 = vsyncpa [#allocation5], 0  ;;  %s241_s0 = inlined_call_operand.hbm [shape: f32[17], index: 0, kind: input, shape index: {}]   ;;  %s242_s1 = inlined_call_operand.hbm [shape: f32[2,8,128], index: 1, kind: input, shape index: {}]   ;;  %s243_s2 = inlined_call_operand.hbm [shape: f32[8,128], index: 2, kind: output, shape index: {}]  }
   0x1   :  { %8 = vsyncpa [#allocation3], 0 }
   0x2   :  { %9 = vsyncpa [#allocation4], 0  ;;  %s212_s9 = smov [#allocation2]   ;;  %s213_s12 = smov [#allocation6]  }
   0x3   :  { %17 = dma.hbm_to_smem %s241_s0, 16, %s212_s9, [#allocation5]  }
   0x4   :  { %s23_s13 = sshll.u32 %s213_s12, 4  ;;  %s24_s13 = int_to_ptr.vmem [resolvable:$true] %s23_s13 }
   0x5   :  { %s174_s14 = scalar_lea.vmem %s24_s13, 256  ;;  %p179_p1 = scmp.lt.s32.totalorder %s24_s13, %s24_s13 }
   0x6   :  { %p175_p0 = scmp.ne.s32.totalorder %s24_s13, %s174_s14  ;;  %p180_p2 = scmp.lt.s32.totalorder %s174_s14, %s174_s14 }
   0x8   :  { %p181_p3 = por %p180_p2, %p179_p1 }
   0xa   :  { %p182_p4 = pnand %p181_p3, %p175_p0 }
   0xc   :  { %185 = shalt.err (!%p182_p4)
}
   0xd   :  { %s214_s15 = smov 128   ;;  %s215_s16 = smov 8  }
   0xe   :  { %29 = dma.hbm_to_vmem [thread:$0]  %s242_s1, 256, %s24_s13, [#allocation3], %s214_s15, %s214_s15, %s215_s16  }
   0xf   :  { %206 = dma.done.wait [#allocation5], 16  }
  0x10   :  { %207 = vsyncadd [#allocation5], 4294967280 }
  0x11   :  { %208 = dma.done.wait [#allocation3], 256  }
  0x12   :  { %209 = vsyncadd [#allocation3], 4294967040 }
  0x13   :  { %36 = sfence }
  0x14   :  { %s40_s0 = sld [smem:[#allocation2]]  ;;  %v37_v0 = vld [vmem:[#allocation6] sm:$0xff]  ;;  %v39_v1 = vld [vmem:[#allocation6 + $0x8] sm:$0xff]  ;;  %s216_s6 = smov [#allocation7]  }
  0x15   :  { %s129_s19 = sld [smem:[#allocation2 + $0x2]]  ;;  %s119_s7 = sshll.u32 %s216_s6, 4  ;;  %s120_s7 = int_to_ptr.vmem [resolvable:$true] %s119_s7 }
  0x16   :  { %s130_s20 = sld [smem:[#allocation2 + $0x1]]  ;;  %s186_s8 = scalar_lea.vmem %s120_s7, 128 }
  0x17   :  { %s131_s21 = sld [smem:[#allocation2 + $0x3]]  ;;  %p187_p5 = scmp.ne.s32.totalorder %s120_s7, %s186_s8 }
  0x18   :  { %s132_s22 = sld [smem:[#allocation2 + $0x4]]  ;;  %p191_p6 = scmp.lt.s32.totalorder %s120_s7, %s120_s7 }
  0x19   :  { %s133_s23 = sld [smem:[#allocation2 + $0x7]]  ;;  %p192_p7 = scmp.lt.s32.totalorder %s186_s8, %s186_s8 }
  0x1a   :  { %v41_v2 = vstv %s40_s0  ;;  %s134_s24 = sld [smem:[#allocation2 + $0xa]] }
  0x1b   :  { %v42_v3 = vmul.f32 %v41_v2, %v37_v0  ;;  %v44_v4 = vstv %s129_s19  ;;  %s135_s25 = sld [smem:[#allocation2 + $0x5]]  ;;  %p193_p8 = por %p192_p7, %p191_p6 }
  0x1c   :  { %v47_v5 = vstv %s130_s20  ;;  %s136_s1 = sld [smem:[#allocation2 + $0x8]] }
  0x1d   :  { %v45_v6 = vadd.f32 %v44_v4, %v42_v3  ;;  %v48_v7 = vmul.f32 %v47_v5, %v39_v1  ;;  %v50_v8 = vstv %s131_s21  ;;  %s137_s26 = sld [smem:[#allocation2 + $0xb]]  ;;  %p194_p9 = pnand %p193_p8, %p187_p5 }
  0x1e   :  { %v53_v9 = vstv %s132_s22  ;;  %s138_s27 = sld [smem:[#allocation2 + $0x6]] }
  0x1f   :  { %v51_v10 = vadd.f32 %v50_v8, %v48_v7  ;;  %v54_v11 = vmul.f32 %v53_v9, %v45_v6  ;;  %v56_v12 = vstv %s133_s23  ;;  %s139_s28 = sld [smem:[#allocation2 + $0x9]] }
  0x20   :  { %s140_s29 = sld [smem:[#allocation2 + $0xc]]  ;;  %v60_v15 = vstv %s134_s24 }
  0x21   :  { %v57_v13 = vmul.f32 %v56_v12, %v51_v10  ;;  %v67_v14 = vstv %s135_s25  ;;  %s141_s30 = sld [smem:[#allocation2 + $0xd]] }
  0x22   :  { %v68_v16 = vmul.f32 %v67_v14, %v45_v6  ;;  %v70_v17 = vstv %s136_s1  ;;  %s142_s3 = sld [smem:[#allocation2 + $0xe]] }
  0x23   :  { %v58_v18 = vadd.f32 %v57_v13, %v54_v11  ;;  %v71_v19 = vmul.f32 %v70_v17, %v51_v10  ;;  %v74_v20 = vstv %s137_s26  ;;  %s143_s4 = sld [smem:[#allocation2 + $0xf]] }
  0x24   :  { %v81_v21 = vstv %s138_s27  ;;  %s144_s5 = sld [smem:[#allocation2 + $0x10]] }
  0x25   :  { %v61_v22 = vadd.f32 %v60_v15, %v58_v18  ;;  %v72_v23 = vadd.f32 %v71_v19, %v68_v16  ;;  %v82_v24 = vmul.f32 %v81_v21, %v45_v6  ;;  %v84_v25 = vstv %s139_s28 }
  0x26   :  { %v85_v26 = vmul.f32 %v84_v25, %v51_v10  ;;  %v88_v29 = vstv %s140_s29 }
  0x27   :  { %v62_v27 = vmul.f32 0.5, %v61_v22  ;;  %v75_v28 = vadd.f32 %v74_v20, %v72_v23  ;;  %v95_v37 = vstv %s141_s30 }
  0x28   :  { %v86_v30 = vadd.f32 %v85_v26, %v82_v24  ;;  %v98_v40 = vstv %s142_s3 }
  0x29   :  { %150 = vtanh.f32 %v62_v27  ;;  %v76_v31 = vmul.f32 0.5, %v75_v28  ;;  %v102_v46 = vstv %s143_s4 }
  0x2a   :  { %v89_v32 = vadd.f32 %v88_v29, %v86_v30  ;;  %v106_v50 = vstv %s144_s5 }
  0x2b   :  { %152 = vtanh.f32 %v76_v31 }
  0x2c   :  { %v90_v33 = vmul.f32 0.5, %v89_v32 }
  0x2e   :  { %154 = vtanh.f32 %v90_v33 }
  0x36   :  { %v151_v34 = vpop.eup %150 }
  0x37   :  { %v64_v35 = vmul.f32 0.5, %v151_v34 }
  0x38   :  { %v153_v36 = vpop.eup %152 }
  0x39   :  { %v65_v38 = vadd.f32 0.5, %v64_v35  ;;  %v78_v39 = vmul.f32 0.5, %v153_v36 }
  0x3b   :  { %v155_v41 = vpop.eup %154  ;;  %v79_v42 = vadd.f32 0.5, %v78_v39  ;;  %v96_v43 = vmul.f32 %v95_v37, %v65_v38 }
  0x3c   :  { %v92_v44 = vmul.f32 0.5, %v155_v41 }
  0x3d   :  { %v99_v45 = vmul.f32 %v98_v40, %v79_v42 }
  0x3e   :  { %v93_v47 = vadd.f32 0.5, %v92_v44 }
  0x3f   :  { %v100_v48 = vadd.f32 %v99_v45, %v96_v43 }
  0x40   :  { %v103_v49 = vmul.f32 %v102_v46, %v93_v47 }
  0x42   :  { %v104_v51 = vadd.f32 %v103_v49, %v100_v48 }
  0x44   :  { %v107_v52 = vadd.f32 %v106_v50, %v104_v51 }
  0x46   :  { %v108_v53 = vmul.f32 0.5, %v107_v52 }
  0x48   :  { %156 = vtanh.f32 %v108_v53 }
  0x55   :  { %v157_v54 = vpop.eup %156 }
  0x56   :  { %v110_v55 = vmul.f32 0.5, %v157_v54 }
  0x58   :  { %v111_v56 = vadd.f32 0.5, %v110_v55 }
  0x5a   :  { %112 = vst [vmem:[#allocation7] sm:$0xff] %v111_v56 }
  0x5b   :  { %197 = shalt.err (!%p194_p9)
}
  0x5c   :  { %122 = dma.vmem_to_hbm [thread:$0]  %s120_s7, 128, %s243_s2, [#allocation4]  }
  0x5d   :  { %210 = dma.done.wait [#allocation4], 128  }
  0x5e   :  { %211 = vsyncadd [#allocation4], 4294967168 }
  0x5f   :  { %126 = vsyncpa [#allocation3], 1 }
  0x60   :  { %127 = vsyncpa [#allocation4], 1 }
  0x61   :  { %128 = vsyncpa [#allocation5], 1 }

</bundles_post_ra>
